<compile_context>
chip_gen: v5e
topology: v5e:2x2
jax: 0.10.0
libtpu: 0.0.40
codegen_flags: <defaults>
</compile_context>

<pallas_src>
import jax
import jax.numpy as jnp
from jax.experimental import pallas as pl
from jax.experimental.pallas import tpu as pltpu


def _round_up(x: int, m: int) -> int:
    return (x + m - 1) // m * m


# ---------------------------------------------------------------------------
# Kernels
# ---------------------------------------------------------------------------
def _linear_kernel_single_k(x_ref, w_ref, b_ref, o_ref):
    """Whole K resident in VMEM: one MXU dot + bias per (tm, tn) output tile."""
    o_ref[...] = (
        jnp.dot(x_ref[...], w_ref[...], preferred_element_type=jnp.float32)
        + b_ref[...]
    ).astype(o_ref.dtype)


def _linear_kernel_kred(x_ref, w_ref, b_ref, o_ref):
    """K tiled on the last ("arbitrary") grid axis.

    The f32 output block is resident across K, so accumulate directly into it
    (no VMEM scratch, no zero-init store): k==0 writes, k>0 adds, last k adds
    the bias.
    """
    k = pl.program_id(2)
    partial = jnp.dot(x_ref[...], w_ref[...], preferred_element_type=jnp.float32)

    @pl.when(k == 0)
    def _():
        o_ref[...] = partial

    @pl.when(k != 0)
    def _():
        o_ref[...] = o_ref[...] + partial

    @pl.when(k == pl.num_programs(2) - 1)
    def _():
        o_ref[...] = o_ref[...] + b_ref[...]


# ---------------------------------------------------------------------------
# Wrapper
# ---------------------------------------------------------------------------
def make_mlp_forward(weight, bias, *, compute_dtype=None,
                     tm_max=512, tn_max=512, tk_max=2048):
    """Build a jitted forward(x) = x @ weight.T + bias.

    weight: [C_out, C_in] (PyTorch layout), bias: [C_out].
    Weight is transposed/padded once here (hoisted out of the forward path) so
    the MXU always sees a lane-dense [K, N] RHS tile.
    """
    C_out, C_in = weight.shape

    tn = min(tn_max, _round_up(C_out, 128))
    Np = _round_up(C_out, tn)

    Kp128 = _round_up(C_in, 128)
    if Kp128 <= tk_max:
        tk = Kp128                      # whole K fits: drop the reduction axis
    else:
        tk = tk_max
    Kp = _round_up(C_in, tk)

    w_dtype = compute_dtype if compute_dtype is not None else weight.dtype
    # One-time transpose to [C_in, C_out] + pad + (optional) cast.
    wt = jnp.pad(weight.T.astype(w_dtype), ((0, Kp - C_in), (0, Np - C_out)))
    bp = jnp.pad(bias.astype(jnp.float32), (0, Np - C_out)).reshape(1, Np)

    def forward(x):
        B = x.shape[0]
        assert x.shape[1] == C_in
        x_dtype = compute_dtype if compute_dtype is not None else x.dtype
        out_dtype = jnp.float32

        tm = min(tm_max, _round_up(B, 8))
        Mp = _round_up(B, tm)
        grid_m, grid_n, grid_k = Mp // tm, Np // tn, Kp // tk

        # v7x megacore: make sure the parallel (M, N) grid has >= 2 blocks.
        if grid_m * grid_n < 2 and B >= 16:
            tm = _round_up((B + 1) // 2, 8)
            Mp = _round_up(B, tm)
            grid_m = Mp // tm

        xp = x.astype(x_dtype)
        if (Mp, Kp) != (B, C_in):       # skip the extra HBM pass when aligned
            xp = jnp.pad(xp, ((0, Mp - B), (0, Kp - C_in)))

        ix = jnp.dtype(x_dtype).itemsize
        iw = jnp.dtype(w_dtype).itemsize
        io = jnp.dtype(out_dtype).itemsize

        # Double-buffered VMEM footprint of this tile plan (+ headroom),
        # capped so it stays safely inside v7x's 64 MiB physical VMEM.
        vmem_needed = 2 * (tm * tk * ix + tk * tn * iw + tn * 4 + tm * tn * io)
        vmem_limit = int(min(48 * 1024 * 1024,
                             max(32 * 1024 * 1024, 2 * vmem_needed)))

        # Actual streamed bytes: x re-read per N block, W re-read per M block.
        bytes_accessed = (grid_n * Mp * Kp * ix
                          + grid_m * Kp * Np * iw
                          + grid_m * Np * 4
                          + Mp * Np * io)
        cost = pl.CostEstimate(flops=2 * Mp * Kp * Np,
                               transcendentals=0,
                               bytes_accessed=int(bytes_accessed))

        if grid_k == 1:
            kernel = _linear_kernel_single_k
            grid = (grid_m, grid_n)
            in_specs = [
                pl.BlockSpec((tm, tk), lambda i, j: (i, 0)),   # x tile [tm, K]
                pl.BlockSpec((tk, tn), lambda i, j: (0, j)),   # W tile [K, tn]
                pl.BlockSpec((1, tn), lambda i, j: (0, j)),    # bias tile
            ]
            out_spec = pl.BlockSpec((tm, tn), lambda i, j: (i, j))
            dims = ("parallel", "parallel")
        else:
            kernel = _linear_kernel_kred
            grid = (grid_m, grid_n, grid_k)
            in_specs = [
                pl.BlockSpec((tm, tk), lambda i, j, k: (i, k)),  # x tile
                pl.BlockSpec((tk, tn), lambda i, j, k: (k, j)),  # W tile [K, N]
                pl.BlockSpec((1, tn), lambda i, j, k: (0, j)),   # bias tile
            ]
            out_spec = pl.BlockSpec((tm, tn), lambda i, j, k: (i, j))
            dims = ("parallel", "parallel", "arbitrary")

        out_padded = pl.pallas_call(
            kernel,
            out_shape=jax.ShapeDtypeStruct((Mp, Np), out_dtype),
            grid_spec=pltpu.PrefetchScalarGridSpec(
                num_scalar_prefetch=0,
                grid=grid,
                in_specs=in_specs,
                out_specs=out_spec,
            ),
            compiler_params=pltpu.CompilerParams(
                dimension_semantics=dims,
                vmem_limit_bytes=vmem_limit,
            ),
            cost_estimate=cost,
        )(xp, wt, bp)

        return out_padded[:B, :C_out]

    return jax.jit(forward)


if __name__ == "__main__":
    # Small shapes consistent with MLP(in_channel=32, num_classes=2).
    batch, in_channel, num_classes = 8, 32, 2

    key = jax.random.PRNGKey(0)
    kx, kw, kb = jax.random.split(key, 3)

    x = jax.random.normal(kx, (batch, in_channel), dtype=jnp.float32)
    # Deterministic init mimicking nn.Linear's uniform(-1/sqrt(in), 1/sqrt(in)).
    bound = 1.0 / jnp.sqrt(jnp.float32(in_channel))
    weight = jax.random.uniform(kw, (num_classes, in_channel),
                                minval=-bound, maxval=bound, dtype=jnp.float32)
    bias = jax.random.uniform(kb, (num_classes,),
                              minval=-bound, maxval=bound, dtype=jnp.float32)

    forward = make_mlp_forward(weight, bias)
    out = jax.block_until_ready(forward(x))
    ref = x @ weight.T + bias
    assert out.shape == (batch, num_classes)
    assert jnp.allclose(out, ref, atol=1e-5, rtol=1e-5)

    # Also exercise the K-reduction + megacore-split path (small, fast shapes).
    B2, C_in2, C_out2 = 16, 256, 130
    kx2, kw2, kb2 = jax.random.split(jax.random.PRNGKey(1), 3)
    x2 = jax.random.normal(kx2, (B2, C_in2), dtype=jnp.float32)
    w2 = jax.random.normal(kw2, (C_out2, C_in2), dtype=jnp.float32) * 0.05
    b2 = jax.random.normal(kb2, (C_out2,), dtype=jnp.float32)
    forward2 = make_mlp_forward(w2, b2, tk_max=128)
    out2 = jax.block_until_ready(forward2(x2))
    ref2 = x2 @ w2.T + b2
    assert out2.shape == (B2, C_out2)
    assert jnp.allclose(out2, ref2, atol=1e-4, rtol=1e-4)

    print("KERNEL_OK")
</pallas_src>

<mosaic_0001>
module attributes {stable_mosaic.version = 11 : i64} {
  func.func @_linear_kernel_single_k(%arg0: i32, %arg1: i32, %arg2: memref<8x128xf32, #tpu.memory_space<vmem>>, %arg3: memref<128x128xf32, #tpu.memory_space<vmem>>, %arg4: memref<1x128xf32, #tpu.memory_space<vmem>>, %arg5: memref<8x128xf32, #tpu.memory_space<vmem>>) attributes {dimension_semantics = [#tpu.dimension_semantics<parallel>, #tpu.dimension_semantics<parallel>], iteration_bounds = array<i64: 1, 1>, scalar_prefetch = 0 : i64, scratch_operands = 0 : i64, tpu.core_type = #tpu.core_type<tc>, window_params = [{transform_indices = @transform_0, window_bounds = array<i64: 8, 128>}, {transform_indices = @transform_1, window_bounds = array<i64: 128, 128>}, {transform_indices = @transform_2, window_bounds = array<i64: 1, 128>}, {transform_indices = @transform_3, window_bounds = array<i64: 8, 128>}]} {
    %c0 = arith.constant 0 : index
    %c0_0 = arith.constant 0 : index
    %0 = vector.load %arg2[%c0, %c0_0] : memref<8x128xf32, #tpu.memory_space<vmem>>, vector<8x128xf32>
    %c0_1 = arith.constant 0 : index
    %c0_2 = arith.constant 0 : index
    %1 = vector.load %arg3[%c0_1, %c0_2] : memref<128x128xf32, #tpu.memory_space<vmem>>, vector<128x128xf32>
    %cst = arith.constant dense<0.000000e+00> : vector<8x128xf32>
    %2 = tpu.matmul %0, %1, %cst {dimension_numbers = #tpu.dot_dimension_numbers<[1], [0], [0], [1], [0, 0, 1, 1], [], []>} : vector<8x128xf32>, vector<128x128xf32>, vector<8x128xf32> -> vector<8x128xf32>
    %c0_3 = arith.constant 0 : index
    %c0_4 = arith.constant 0 : index
    %3 = vector.load %arg4[%c0_3, %c0_4] : memref<1x128xf32, #tpu.memory_space<vmem>>, vector<1x128xf32>
    %4 = vector.broadcast %3 : vector<1x128xf32> to vector<8x128xf32>
    %5 = arith.addf %2, %4 : vector<8x128xf32>
    %c0_5 = arith.constant 0 : index
    %c0_6 = arith.constant 0 : index
    %6 = vector.load %arg5[%c0_5, %c0_6] : memref<8x128xf32, #tpu.memory_space<vmem>>, vector<8x128xf32>
    tpu.vector_store %arg5[%c0_5, %c0_6], %5 {strides = array<i32>} : memref<8x128xf32, #tpu.memory_space<vmem>>, vector<8x128xf32>,
    return
  }
  func.func @transform_0(%arg0: i32, %arg1: i32) -> (i32, i32) {
    %c0_i32 = arith.constant 0 : i32
    %c0_i32_0 = arith.constant 0 : i32
    return %arg0, %c0_i32 : i32, i32
  }
  func.func @transform_1(%arg0: i32, %arg1: i32) -> (i32, i32) {
    %c0_i32 = arith.constant 0 : i32
    %c0_i32_0 = arith.constant 0 : i32
    return %c0_i32, %arg1 : i32, i32
  }
  func.func @transform_2(%arg0: i32, %arg1: i32) -> (i32, i32) {
    %c0_i32 = arith.constant 0 : i32
    %c0_i32_0 = arith.constant 0 : i32
    return %c0_i32, %arg1 : i32, i32
  }
  func.func @transform_3(%arg0: i32, %arg1: i32) -> (i32, i32) {
    %c0_i32 = arith.constant 0 : i32
    return %arg0, %arg1 : i32, i32
  }
}

</mosaic_0001>

<bundles_post_ra>
// kernel: forward.1
= control target key start
LH: loop header
LB: loop body
LE: loop exit
PB: predicated region body
PF: predicated region fallthrough
CT: control target
= control target key end

     0   :  { %8 = vsyncpa [#allocation3], 0  ;;  %s107_s15 = smov [#allocation2]   ;;  %s108_s17 = smov 128   ;;  %s142_s0 = inlined_call_operand.vmem [shape: f32[8,128], index: 0, kind: input, shape index: {}]   ;;  %s143_s1 = inlined_call_operand.hbm [shape: f32[128,128], index: 1, kind: input, shape index: {}]   ;;  %s144_s2 = inlined_call_operand.vmem [shape: f32[1,128], index: 2, kind: input, shape index: {}]   ;;  %s145_s3 = inlined_call_operand.vmem [shape: f32[8,128], index: 3, kind: output, shape index: {}]  }
   0x1   :  { %s15_s14 = sshll.u32 %s143_s1, 4  ;;  %s17_s16 = sshll.u32 %s107_s15, 4  ;;  %s16_s14 = int_to_ptr.hbm [resolvable:$true] %s15_s14  ;;  %s18_s16 = int_to_ptr.vmem [resolvable:$true] %s17_s16 }
   0x2   :  { %s109_s18 = smov 8  }
   0x3   :  { %23 = dma.hbm_to_vmem [thread:$0]  %s16_s14, 2048, %s18_s16, [#allocation3], %s108_s17, %s108_s17, %s109_s18  }
   0x4   :  { %105 = dma.done.wait [#allocation3], 2048  }
   0x5   :  { %106 = vsyncadd [#allocation3], 4294965248  ;;  %v46_v0 = vld [vmem:[#allocation2 + $0x78] sm:$0xff]  ;;  %v45_v1 = vld [vmem:[#allocation2 + $0x70] sm:$0xff] }
   0x6   :  { %51 = vmatpush.msra.mxu0 %v46_v0  ;;  %v44_v2 = vld [vmem:[#allocation2 + $0x68] sm:$0xff]  ;;  %v43_v3 = vld [vmem:[#allocation2 + $0x60] sm:$0xff]  ;;  %v42_v4 = vld [vmem:[#allocation2 + $0x58] sm:$0xff] }
   0x7   :  { %v41_v5 = vld [vmem:[#allocation2 + $0x50] sm:$0xff]  ;;  %v40_v6 = vld [vmem:[#allocation2 + $0x48] sm:$0xff]  ;;  %v39_v7 = vld [vmem:[#allocation2 + $0x40] sm:$0xff] }
   0x8   :  { %52 = vmatpush.msra.mxu0 %v45_v1  ;;  %v38_v8 = vld [vmem:[#allocation2 + $0x38] sm:$0xff]  ;;  %v37_v9 = vld [vmem:[#allocation2 + $0x30] sm:$0xff]  ;;  %v36_v10 = vld [vmem:[#allocation2 + $0x28] sm:$0xff] }
   0x9   :  { %v35_v11 = vld [vmem:[#allocation2 + $0x20] sm:$0xff]  ;;  %v34_v12 = vld [vmem:[#allocation2 + $0x18] sm:$0xff]  ;;  %v33_v13 = vld [vmem:[#allocation2 + $0x10] sm:$0xff] }
   0xa   :  { %53 = vmatpush.msra.mxu0 %v44_v2  ;;  %v32_v14 = vld [vmem:[#allocation2 + $0x8] sm:$0xff]  ;;  %v31_v15 = vld [vmem:[#allocation2] sm:$0xff] }
   0xb   :  { %v30_v16 = vld [vmem:[%s142_s0] sm:$0xff] }
   0xc   :  { %54 = vmatpush.msra.mxu0 %v43_v3  ;;  %v80_v17 = vld [vmem:[%s144_s2] ss:$0 sm:$0xff] }
   0xe   :  { %55 = vmatpush.msra.mxu0 %v42_v4 }
  0x10   :  { %56 = vmatpush.msra.mxu0 %v41_v5 }
  0x12   :  { %57 = vmatpush.msra.mxu0 %v40_v6 }
  0x14   :  { %58 = vmatpush.msra.mxu0 %v39_v7 }
  0x16   :  { %59 = vmatpush.msra.mxu0 %v38_v8 }
  0x18   :  { %60 = vmatpush.msra.mxu0 %v37_v9 }
  0x1a   :  { %61 = vmatpush.msra.mxu0 %v36_v10 }
  0x1c   :  { %62 = vmatpush.msra.mxu0 %v35_v11 }
  0x1e   :  { %63 = vmatpush.msra.mxu0 %v34_v12 }
  0x20   :  { %64 = vmatpush.msra.mxu0 %v33_v13 }
  0x22   :  { %65 = vmatpush.msra.mxu0 %v32_v14 }
  0x24   :  { %66 = vmatpush.msra.mxu0 %v31_v15 }
  0x25   :  { %67 = vmatmul.f32.vlgmr.msra.gmra.mxu0 %v30_v16 }
  0xa2   :  { %v68_v18 = vpop.f32.mrf.mxu0 }
  0xa3   :  { %v69_v19 = vadd.f32 %v80_v17, %v68_v18 }
  0xa5   :  { %71 = vst [vmem:[%s145_s3] sm:$0xff] %v69_v19 }
  0xa6   :  { %76 = vsyncpa [#allocation3], 1 }

</bundles_post_ra>
